<compile_context>
chip_gen: v7x
topology: tpu7x:2x2x1
jax: 0.10.0
libtpu: 0.0.40
codegen_flags: <defaults>
</compile_context>

<pallas_src>
import jax
import jax.numpy as jnp
from jax import lax
from jax.experimental import pallas as pl
from jax.experimental.pallas import tpu as pltpu


def _round_up(x, m):
    return ((x + m - 1) // m) * m


# ----------------------------------------------------------------------------
# Pallas kernel: one row tile of   out = D (A + I) D support + bias
# ----------------------------------------------------------------------------
def _gcn_agg_kernel(adj_ref, sd_ref, d_ref, res_ref, o_ref):
    # adj_ref : (TM, N)  adjacency row tile            (compute dtype)
    # sd_ref  : (N, Fp)  D @ (inputs @ weight), full   (compute dtype, resident)
    # d_ref   : (TM, 1)  deg^-1/2 for this row tile    (f32)
    # res_ref : (TM, Fp) d^2 * support + bias          (f32)  [self-loop + bias]
    # o_ref   : (TM, Fp)                               (f32)
    agg = jnp.dot(adj_ref[...], sd_ref[...], preferred_element_type=jnp.float32)
    o_ref[...] = (d_ref[...] * agg + res_ref[...]).astype(o_ref.dtype)


# ----------------------------------------------------------------------------
# Generation-aware tiling helpers
# ----------------------------------------------------------------------------
def _vmem_limit_bytes():
    try:
        phys = int(pltpu.get_tpu_info().vmem_capacity_bytes)
    except Exception:
        phys = 64 * 1024 * 1024  # conservative (v7x per-TC) if query unavailable
    # leave headroom for compiler scratch: 128 MiB parts -> 100 MiB, v7x -> 48 MiB
    return max(32 * 1024 * 1024, min(phys - 16 * 1024 * 1024, 100 * 1024 * 1024))


def _pick_row_tile(N, f_pad, block_rows, adj_itemsize, sd_itemsize, vmem_limit):
    budget = int(0.75 * vmem_limit)
    tm = min(_round_up(block_rows, 8), _round_up(N, 8))

    def resident(t):
        return (2 * t * N * adj_itemsize        # double-buffered adj row tile
                + 2 * N * f_pad * sd_itemsize   # resident D@support (2 bufs)
                + 4 * t * f_pad * 4             # res + out tiles (double buffered, f32)
                + 2 * t * 4)                    # d tile

    while tm > 8 and resident(tm) > budget:
        tm = max(8, _round_up(tm // 2, 8))
    return tm


# ----------------------------------------------------------------------------
# Fused-XLA fallback for small problems (kernel overheads would dominate)
# ----------------------------------------------------------------------------
def _gcn_xla(inputs, adj, weight, bias):
    support = jnp.matmul(inputs, weight)
    diag = jnp.diagonal(adj, axis1=-2, axis2=-1)
    deg = jnp.sum(jnp.abs(adj), axis=-1) - jnp.abs(diag) + jnp.abs(diag + 1.0)
    deg = jnp.maximum(deg, jnp.float32(1e-12))
    d = lax.rsqrt(deg)[..., None]
    sd = support * d
    return d * jnp.matmul(adj, sd) + d * sd + bias


# ----------------------------------------------------------------------------
# Public wrapper
# ----------------------------------------------------------------------------
def graph_convolution(inputs, adj, weight, bias, *, block_rows=256,
                      compute_dtype=jnp.bfloat16, use_pallas=None):
    """norm_adj @ (inputs @ weight) + bias with symmetric |.|-degree normalization.

    compute_dtype: dtype of the adjacency / D@support MXU operands (default bf16,
    f32 accumulation).  Pass jnp.float32 for a bit-faithful aggregation.
    """
    B, N, _ = inputs.shape
    F_out = weight.shape[1]

    if use_pallas is None:
        use_pallas = (N >= 512) and (B * N * N >= (1 << 20))
    if not use_pallas:
        return _gcn_xla(inputs, adj, weight, bias)

    # ---- XLA prep (everything except the dominant (N,N)@(N,F) matmul) -------
    adj_c = adj if adj.dtype == compute_dtype else adj.astype(compute_dtype)

    support = jnp.matmul(inputs, weight)                        # (B, N, F_out) f32
    # degree of (adj + I) without building I, read from the compute-dtype copy
    diag = jnp.diagonal(adj_c, axis1=-2, axis2=-1).astype(jnp.float32)
    deg = (jnp.sum(jnp.abs(adj_c), axis=-1, dtype=jnp.float32)
           - jnp.abs(diag) + jnp.abs(diag + 1.0))
    deg = jnp.maximum(deg, jnp.float32(1e-12))                  # guard isolated nodes
    d = lax.rsqrt(deg)                                          # (B, N) f32

    sd = (support * d[..., None]).astype(compute_dtype)         # D @ support
    res = (d[..., None] * d[..., None]) * support + bias        # self-loop + bias, f32

    # ---- lane-dense column padding of the small tensors only ----------------
    f_pad = _round_up(F_out, 128)
    sd_p = jnp.pad(sd, ((0, 0), (0, 0), (0, f_pad - F_out)))
    res_p = jnp.pad(res, ((0, 0), (0, 0), (0, f_pad - F_out))).astype(jnp.float32)
    d_p = d[..., None].astype(jnp.float32)                      # (B, N, 1)

    adj_isz = jnp.dtype(compute_dtype).itemsize
    vmem_limit = _vmem_limit_bytes()
    tm = _pick_row_tile(N, f_pad, block_rows, adj_isz, adj_isz, vmem_limit)
    grid = (B, pl.cdiv(N, tm))

    cost = pl.CostEstimate(
        flops=2 * B * N * N * f_pad,
        transcendentals=0,
        bytes_accessed=(B * N * N * adj_isz            # adj (streamed once)
                        + B * N * f_pad * adj_isz      # sd
                        + 2 * B * N * f_pad * 4        # res + out
                        + B * N * 4),                  # d
    )

    out_p = pl.pallas_call(
        _gcn_agg_kernel,
        out_shape=jax.ShapeDtypeStruct((B, N, f_pad), jnp.float32),
        grid_spec=pltpu.PrefetchScalarGridSpec(
            num_scalar_prefetch=0,
            grid=grid,
            in_specs=[
                # adjacency row tile, full (unpadded) column extent, streamed
                pl.BlockSpec((pl.Squeezed(), tm, N), lambda b, i: (b, i, 0)),
                # full D@support for this batch element (resident across row tiles)
                pl.BlockSpec((pl.Squeezed(), N, f_pad), lambda b, i: (b, 0, 0)),
                # per-row deg^-1/2 for this tile
                pl.BlockSpec((pl.Squeezed(), tm, 1), lambda b, i: (b, i, 0)),
                # self-loop + bias term for this tile
                pl.BlockSpec((pl.Squeezed(), tm, f_pad), lambda b, i: (b, i, 0)),
            ],
            out_specs=pl.BlockSpec((pl.Squeezed(), tm, f_pad),
                                   lambda b, i: (b, i, 0)),
        ),
        compiler_params=pltpu.CompilerParams(
            dimension_semantics=("parallel", "parallel"),
            vmem_limit_bytes=int(vmem_limit),
        ),
        cost_estimate=cost,
    )(adj_c, sd_p, d_p, res_p)

    return out_p[..., :F_out]


# ----------------------------------------------------------------------------
# Plain-JAX reference mirroring the PyTorch forward exactly
# ----------------------------------------------------------------------------
def graph_convolution_ref(inputs, adj, weight, bias):
    support = jnp.matmul(inputs, weight)
    n = adj.shape[-1]
    eye = jnp.broadcast_to(jnp.eye(n, dtype=adj.dtype), adj.shape)
    adj_post = adj + eye
    deg_abs = jnp.sum(jnp.abs(adj_post), axis=-1)
    deg_abs_sqrt = deg_abs ** -0.5
    diag_deg = jax.vmap(jnp.diag)(deg_abs_sqrt)
    norm_adj = jnp.matmul(jnp.matmul(diag_deg, adj_post), diag_deg)
    out = jnp.matmul(jnp.swapaxes(support, 1, 2), jnp.swapaxes(norm_adj, 1, 2))
    out = jnp.swapaxes(out, 1, 2)
    return out + bias


if __name__ == "__main__":
    # keep the XLA-side f32 matmuls full precision so the comparison is meaningful
    jax.config.update("jax_default_matmul_precision", "highest")

    key = jax.random.PRNGKey(0)
    k_x, k_adj, k_w, k_b, k_x2, k_adj2 = jax.random.split(key, 6)

    stdv = 0.5                      # reset_parameters(): uniform(-0.5, 0.5)
    F_in, F_out = 8, 32
    weight = jax.random.uniform(k_w, (F_in, F_out), dtype=jnp.float32,
                                minval=-stdv, maxval=stdv)
    bias = jax.random.uniform(k_b, (F_out,), dtype=jnp.float32,
                              minval=-stdv, maxval=stdv)

    # --- case 1: small shapes, single row tile, f32 path, force the kernel ---
    B1, N1 = 2, 16
    x1 = jax.random.normal(k_x, (B1, N1, F_in), dtype=jnp.float32)
    a1 = jax.random.uniform(k_adj, (B1, N1, N1), dtype=jnp.float32)
    out1 = jax.block_until_ready(
        graph_convolution(x1, a1, weight, bias, block_rows=128,
                          compute_dtype=jnp.float32, use_pallas=True))
    ref1 = graph_convolution_ref(x1, a1, weight, bias)
    assert out1.shape == ref1.shape == (B1, N1, F_out)
    assert jnp.allclose(out1, ref1, atol=1e-3, rtol=1e-3), \
        float(jnp.max(jnp.abs(out1 - ref1)))

    # --- case 2: N not a multiple of the tile -> ragged edge tile, f32 path --
    B2, N2 = 1, 200
    x2 = jax.random.normal(k_x2, (B2, N2, F_in), dtype=jnp.float32)
    a2 = jax.random.uniform(k_adj2, (B2, N2, N2), dtype=jnp.float32)
    out2 = jax.block_until_ready(
        graph_convolution(x2, a2, weight, bias, block_rows=64,
                          compute_dtype=jnp.float32, use_pallas=True))
    ref2 = graph_convolution_ref(x2, a2, weight, bias)
    assert out2.shape == ref2.shape == (B2, N2, F_out)
    assert jnp.allclose(out2, ref2, atol=1e-3, rtol=1e-3), \
        float(jnp.max(jnp.abs(out2 - ref2)))

    # --- case 2 again on the default bf16 aggregation path (f32 accumulation)
    out2_bf16 = jax.block_until_ready(
        graph_convolution(x2, a2, weight, bias, block_rows=64, use_pallas=True))
    assert jnp.allclose(out2_bf16, ref2, atol=5e-2, rtol=5e-2), \
        float(jnp.max(jnp.abs(out2_bf16 - ref2)))

    # --- auto-dispatch: these shapes are small -> fused XLA fallback ----------
    out3 = jax.block_until_ready(graph_convolution(x1, a1, weight, bias))
    assert jnp.allclose(out3, ref1, atol=1e-3, rtol=1e-3), \
        float(jnp.max(jnp.abs(out3 - ref1)))

    print("KERNEL_OK")
</pallas_src>

<mosaic_0001>
module attributes {stable_mosaic.version = 11 : i64} {
  func.func @_gcn_agg_kernel(%arg0: i32, %arg1: i32, %arg2: memref<1x16x16xf32, #tpu.memory_space<vmem>>, %arg3: memref<1x16x128xf32, #tpu.memory_space<vmem>>, %arg4: memref<1x16x1xf32, #tpu.memory_space<vmem>>, %arg5: memref<1x16x128xf32, #tpu.memory_space<vmem>>, %arg6: memref<1x16x128xf32, #tpu.memory_space<vmem>>) attributes {dimension_semantics = [#tpu.dimension_semantics<parallel>, #tpu.dimension_semantics<parallel>], iteration_bounds = array<i64: 2, 1>, scalar_prefetch = 0 : i64, scratch_operands = 0 : i64, tpu.core_type = #tpu.core_type<tc>, window_params = [{transform_indices = @transform_0, window_bounds = array<i64: 1, 16, 16>}, {transform_indices = @transform_1, window_bounds = array<i64: 1, 16, 128>}, {transform_indices = @transform_2, window_bounds = array<i64: 1, 16, 1>}, {transform_indices = @transform_3, window_bounds = array<i64: 1, 16, 128>}, {transform_indices = @transform_4, window_bounds = array<i64: 1, 16, 128>}]} {
    %c0 = arith.constant 0 : index
    %c0_0 = arith.constant 0 : index
    %c0_1 = arith.constant 0 : index
    %0 = vector.load %arg2[%c0, %c0_0, %c0_1] : memref<1x16x16xf32, #tpu.memory_space<vmem>>, vector<1x16x16xf32>
    %1 = vector.shape_cast %0 : vector<1x16x16xf32> to vector<16x16xf32>
    %c0_2 = arith.constant 0 : index
    %c0_3 = arith.constant 0 : index
    %c0_4 = arith.constant 0 : index
    %2 = vector.load %arg3[%c0_2, %c0_3, %c0_4] : memref<1x16x128xf32, #tpu.memory_space<vmem>>, vector<1x16x128xf32>
    %3 = vector.shape_cast %2 : vector<1x16x128xf32> to vector<16x128xf32>
    %cst = arith.constant dense<0.000000e+00> : vector<16x128xf32>
    %4 = tpu.matmul %1, %3, %cst {dimension_numbers = #tpu.dot_dimension_numbers<[1], [0], [0], [1], [0, 0, 1, 1], [], []>, precision = #tpu.contract_precision<fp32>} : vector<16x16xf32>, vector<16x128xf32>, vector<16x128xf32> -> vector<16x128xf32>
    %c0_5 = arith.constant 0 : index
    %c0_6 = arith.constant 0 : index
    %c0_7 = arith.constant 0 : index
    %5 = vector.load %arg4[%c0_5, %c0_6, %c0_7] : memref<1x16x1xf32, #tpu.memory_space<vmem>>, vector<1x16x1xf32>
    %6 = vector.shape_cast %5 : vector<1x16x1xf32> to vector<16x1xf32>
    %7 = vector.broadcast %6 : vector<16x1xf32> to vector<16x128xf32>
    %8 = arith.mulf %7, %4 : vector<16x128xf32>
    %c0_8 = arith.constant 0 : index
    %c0_9 = arith.constant 0 : index
    %c0_10 = arith.constant 0 : index
    %9 = vector.load %arg5[%c0_8, %c0_9, %c0_10] : memref<1x16x128xf32, #tpu.memory_space<vmem>>, vector<1x16x128xf32>
    %10 = vector.shape_cast %9 : vector<1x16x128xf32> to vector<16x128xf32>
    %11 = arith.addf %8, %10 : vector<16x128xf32>
    %c0_11 = arith.constant 0 : index
    %c0_12 = arith.constant 0 : index
    %c0_13 = arith.constant 0 : index
    %12 = vector.load %arg6[%c0_11, %c0_12, %c0_13] : memref<1x16x128xf32, #tpu.memory_space<vmem>>, vector<1x16x128xf32>
    %13 = vector.shape_cast %12 : vector<1x16x128xf32> to vector<16x128xf32>
    %14 = vector.shape_cast %11 : vector<16x128xf32> to vector<1x16x128xf32>
    tpu.vector_store %arg6[%c0_11, %c0_12, %c0_13], %14 {strides = array<i32>} : memref<1x16x128xf32, #tpu.memory_space<vmem>>, vector<1x16x128xf32>,
    return
  }
  func.func @transform_0(%arg0: i32, %arg1: i32) -> (i32, i32, i32) {
    %c0_i32 = arith.constant 0 : i32
    %c0_i32_0 = arith.constant 0 : i32
    return %arg0, %arg1, %c0_i32 : i32, i32, i32
  }
  func.func @transform_1(%arg0: i32, %arg1: i32) -> (i32, i32, i32) {
    %c0_i32 = arith.constant 0 : i32
    %c0_i32_0 = arith.constant 0 : i32
    %c0_i32_1 = arith.constant 0 : i32
    return %arg0, %c0_i32, %c0_i32_0 : i32, i32, i32
  }
  func.func @transform_2(%arg0: i32, %arg1: i32) -> (i32, i32, i32) {
    %c0_i32 = arith.constant 0 : i32
    %c0_i32_0 = arith.constant 0 : i32
    return %arg0, %arg1, %c0_i32 : i32, i32, i32
  }
  func.func @transform_3(%arg0: i32, %arg1: i32) -> (i32, i32, i32) {
    %c0_i32 = arith.constant 0 : i32
    %c0_i32_0 = arith.constant 0 : i32
    return %arg0, %arg1, %c0_i32 : i32, i32, i32
  }
  func.func @transform_4(%arg0: i32, %arg1: i32) -> (i32, i32, i32) {
    %c0_i32 = arith.constant 0 : i32
    %c0_i32_0 = arith.constant 0 : i32
    return %arg0, %arg1, %c0_i32 : i32, i32, i32
  }
}

</mosaic_0001>

<bundles_post_ra>
// kernel: tpu_custom_call.1
= control target key start
LH: loop header
LB: loop body
LE: loop exit
PB: predicated region body
PF: predicated region fallthrough
CT: control target
= control target key end

     0   :  { %9 = vsyncpa [#allocation3], 0  ;;  %s1678_s0 = inlined_call_operand.vmem [shape: f32[2,16,16], index: 0, kind: input, shape index: {}]   ;;  %s1679_s1 = inlined_call_operand.hbm [shape: f32[2,16,128], index: 1, kind: input, shape index: {}]   ;;  %s1680_s2 = inlined_call_operand.vmem [shape: f32[2,16,1], index: 2, kind: input, shape index: {}]   ;;  %s1681_s3 = inlined_call_operand.hbm [shape: f32[2,16,128], index: 3, kind: input, shape index: {}]   ;;  %s1682_s4 = inlined_call_operand.hbm [shape: f32[2,16,128], index: 4, kind: output, shape index: {}]  }
   0x1   :  { %11 = vsyncpa [#allocation3 + $0x1], 0 }
   0x2   :  { %12 = vsyncpa [#allocation6], 0 }
   0x3   :  { %14 = vsyncpa [#allocation6 + $0x1], 0 }
   0x4   :  { %15 = vsyncpa [#allocation4], 0 }
   0x5   :  { %17 = vsyncpa [#allocation4 + $0x1], 0  ;;  %s1425_s15 = smov 0   ;;  %s1427_s16 = smov 0  }
   0x6   :  { %s1429_s17 = smov 0   ;;  %s1431_s18 = smov 0  }
   0x7   :  { %s1433_s19 = smov 0   ;;  %s1435_s20 = smov 0  }
   0x8 LB: > { %s1043_s21 = sadd.s32 4294967295, %s1390_s20   ;;  %s1044_s22 = sadd.s32 4294967294, %s1390_s20   ;;  %s1390_s20 = sphi %s1435_s20, %s23_s20   ;;  %s1386_s19 = sphi %s1433_s19, %s1702_s19   ;;  %s1382_s18 = sphi %s1431_s18, %s1701_s18   ;;  %s1378_s17 = sphi %s1429_s17, %s1700_s17   ;;  %s1374_s16 = sphi %s1427_s16, %s1699_s16   ;;  %s1370_s15 = sphi %s1425_s15, %s1698_s15  }
   0x9   : > { %s35_s23 = sadd.s32 1, %s1386_s19  ;;  %s70_s24 = sadd.s32 1, %s1378_s17 }
   0xa   : > { %p37_p0 = scmp.ge.s32.totalorder %s35_s23, 2  ;;  %p77_p1 = scmp.ne.s32.totalorder %s1378_s17, %s1374_s16 }
   0xb   : > { %p78_p2 = scmp.eq.s32.totalorder %s1390_s20, 0  ;;  %p83_p3 = scmp.ne.s32.totalorder %s1374_s16, %s1370_s15 }
   0xc   : > { %s1704_s23 = smov (%p37_p0, %s35_s23), 0  ;;  %p84_p5 = scmp.eq.s32.totalorder %s1043_s21, 0 }
   0xd   : > { %p1466_p4 = por %p78_p2, %p77_p1  ;;  %s67_s26 = ssub.s32 %s1386_s19, %s1704_s23 }
   0xe   : > { %p165_p6 = scmp.eq.s32.totalorder %s1043_s21, 1  ;;  %p68_p7 = scmp.eq.s32.totalorder %s67_s26, 0 }
   0xf   : > { %p1472_p8 = por %p84_p5, %p83_p3  ;;  %p171_p10 = scmp.eq.s32.totalorder %s1044_s22, 1 }
  0x10   : > { %p1476_p9 = por %p165_p6, %p77_p1  ;;  %p1188_p13 = scmp.lt.s32.totalorder %s1390_s20, 2 }
  0x11   : > { %s1687_s27 = scalar_select %p1472_p8, 1, 0 }
  0x12   : > { %s1688_s28 = scalar_select %p1476_p9, 1, 0 }
  0x13   : > { %s1481_s29 = scalar_select %p68_p7, %s1378_s17, %s70_s24  }
  0x14   : > { %p1483_p11 = por %p171_p10, %p83_p3  ;;  %s1490_s5 = sand.u32 1, %s1378_s17  }
  0x15   : > { %s1047_s6 = sshll.u32 %s1490_s5, 4  ;;  %s1066_s7 = sshll.u32 %s1386_s19, 8 }
  0x16   : > { %s1689_s30 = scalar_select %p1483_p11, 1, 0 }
  0x17   : > { %s1499_s10 = scalar_lea.hbm %s1679_s1, %s1066_s7  ;;  %s208_s11 = scalar_lea.vmem [#allocation2], %s1047_s6 }
  0x18   : > { %s215_s12 = sshll.u32 %s208_s11, 4  ;;  %p1507_p0 = pnand %p1188_p13, %p1466_p4  ;;  %s1503_s12 = int_to_ptr.vmem [resolvable:$true] %s215_s12 }
  0x19   : > { %s205_s14 = scalar_lea.sflag [#allocation3], %s1490_s5  ;;  %s1244_s21 = scalar_lea.hbm %s1499_s10, 256 }
  0x1a   : > { %p1245_p2 = scmp.ne.s32.totalorder %s1499_s10, %s1244_s21  ;;  %p1246_p3 = pneg %p1507_p0 }
  0x1b   : > { %s1249_s25 = scalar_lea.hbm %s1679_s1, 512  ;;  %p1250_p4 = scmp.lt.u32.totalorder %s1499_s10, %s1679_s1 }
  0x1c   : > { %p1247_p5 = pnand %p1246_p3, %p1245_p2  ;;  %p1251_p7 = scmp.lt.u32.totalorder %s1249_s25, %s1244_s21 }
  0x1d   : > { %p1253_p13 = scmp.lt.u32.totalorder %s1244_s21, %s1499_s10 }
  0x1e   : > { %p1248_p6 = pneg %p1247_p5  ;;  %p1252_p10 = por %p1251_p7, %p1250_p4 }
  0x20   : > { %p1254_p12 = por %p1253_p13, %p1252_p10 }
  0x22   : > { %p1255_p1 = pnand %p1254_p12, %p1248_p6 }
  0x24   : > { %1258 = shalt.err (!%p1255_p1)
}
  0x25   : > { %s1259_s9 = scalar_lea.vmem %s1503_s12, 256  ;;  %s1392_s11 = smov [#allocation2]  }
  0x26   : > { %p1260_p2 = scmp.ne.s32.totalorder %s1503_s12, %s1259_s9  ;;  %s1264_s22 = sshll.u32 %s1392_s11, 4  ;;  %s1265_s22 = int_to_ptr.vmem [resolvable:$false] %s1264_s22 }
  0x27   : > { %s1266_s24 = scalar_lea.vmem %s1265_s22, 512  ;;  %p1267_p9 = scmp.lt.s32.totalorder %s1503_s12, %s1265_s22 }
  0x28   : > { %p1262_p5 = pnand %p1260_p2, %p1246_p3  ;;  %p1268_p4 = scmp.lt.s32.totalorder %s1266_s24, %s1259_s9 }
  0x2a   : > { %p1263_p11 = pneg %p1262_p5  ;;  %p1269_p7 = por %p1268_p4, %p1267_p9 }
  0x2c   : > { %p1270_p10 = pnand %p1269_p7, %p1263_p11 }
  0x2e   : > { %1273 = shalt.err (!%p1270_p10)
}
  0x2f   : > { %s1684_s21 = smov 128   ;;  %s1394_s25 = smov 8  }
  0x30   : > { %1180 = dma.hbm_to_vmem [thread:$0]  (!%p1507_p0), %s1499_s10, 256, %s1503_s12, %s205_s14, %s1684_s21, %s1684_s21, %s1394_s25  }
  0x31   : > { %p259_p9 = scmp.lt.s32.totalorder %s1390_s20, 3  ;;  %s1549_s9 = scalar_lea.hbm %s1681_s3, %s1066_s7 }
  0x32   : > { %p1691_p11 = scmp.ge.s32.totalorder %s1390_s20, 1  ;;  %s242_s22 = scalar_lea.vmem [#allocation5], %s1047_s6 }
  0x33   : > { %s251_s24 = sshll.u32 %s242_s22, 4  ;;  %s239_s10 = scalar_lea.sflag [#allocation6], %s1490_s5  ;;  %s1559_s24 = int_to_ptr.vmem [resolvable:$true] %s251_s24 }
  0x34   : > { %p1553_p12 = pnand %p1691_p11, %p259_p9  ;;  %s1274_s12 = scalar_lea.hbm %s1549_s9, 256 }
  0x35   : > { %p1275_p1 = scmp.ne.s32.totalorder %s1549_s9, %s1274_s12  ;;  %s1279_s26 = scalar_lea.hbm %s1681_s3, 512 }
  0x36   : > { %p1280_p2 = scmp.lt.u32.totalorder %s1549_s9, %s1681_s3  ;;  %p1281_p5 = scmp.lt.u32.totalorder %s1279_s26, %s1274_s12 }
  0x37   : > { %p1277_p6 = pnand %p1275_p1, %p1246_p3  ;;  %p1283_p7 = scmp.lt.u32.totalorder %s1274_s12, %s1549_s9 }
  0x38   : > { %p1282_p4 = por %p1281_p5, %p1280_p2 }
  0x39   : > { %p1278_p13 = pneg %p1277_p6 }
  0x3a   : > { %p1284_p10 = por %p1283_p7, %p1282_p4 }
  0x3c   : > { %p1285_p9 = pnand %p1284_p10, %p1278_p13 }
  0x3e   : > { %1288 = shalt.err (!%p1285_p9)
}
  0x3f   : > { %s1289_s6 = scalar_lea.vmem %s1559_s24, 256  ;;  %s1395_s22 = smov [#allocation5]  }
  0x40   : > { %p1290_p11 = scmp.ne.s32.totalorder %s1559_s24, %s1289_s6  ;;  %s1294_s7 = sshll.u32 %s1395_s22, 4  ;;  %s1295_s7 = int_to_ptr.vmem [resolvable:$false] %s1294_s7 }
  0x41   : > { %s1296_s21 = scalar_lea.vmem %s1295_s7, 512  ;;  %p1297_p8 = scmp.lt.s32.totalorder %s1559_s24, %s1295_s7 }
  0x42   : > { %p1292_p1 = pnand %p1290_p11, %p1246_p3  ;;  %p1298_p2 = scmp.lt.s32.totalorder %s1296_s21, %s1289_s6 }
  0x44   : > { %p1293_p6 = pneg %p1292_p1  ;;  %p1299_p5 = por %p1298_p2, %p1297_p8 }
  0x46   : > { %p1300_p4 = pnand %p1299_p5, %p1293_p6 }
  0x48   : > { %1303 = shalt.err (!%p1300_p4)
}
  0x49   : > { %s1693_s12 = smov 128   ;;  %263 = sbr.rel (%p1553_p12) target bundleno = 352 (0x160), region = 36 }
  0x4a   : > { %1183 = dma.hbm_to_vmem [thread:$0]  (!%p1507_p0), %s1549_s9, 256, %s1559_s24, %s239_s10, %s1693_s12, %s1693_s12, %s1394_s25  }
  0x4b   : > { %s1593_s14 = sand.u32 (!%p1553_p12), 1, %s1374_s16   ;;  %p1694_p8 = scmp.ne.s32.totalorder (!%p1553_p12), %s1687_s27, 0 }
  0x4c   : > { %s1596_s26 = sshll.u32 (!%p1553_p12), %s1593_s14, 4  ;;  %s266_s13 = scalar_lea.sflag (!%p1553_p12), [#allocation3], %s1593_s14 }
  0x4d   : > { %s269_s8 = scalar_lea.vmem (!%p1553_p12), [#allocation2], %s1596_s26 }
  0x50   : > { %1357 = dma.done.wait (%p1694_p8), %s266_s13, 256  }
  0x51   : > { %1359 = vsyncadd (%p1694_p8), %s266_s13, 4294967040  ;;  %s275_s5 = scalar_lea.sflag [#allocation6], %s1593_s14  ;;  %s278_s25 = scalar_lea.vmem [#allocation5], %s1596_s26 }
  0x52   : > { %1361 = dma.done.wait (%p1694_p8), %s275_s5, 256  }
  0x53   : > { %1363 = vsyncadd (%p1694_p8), %s275_s5, 4294967040  ;;  %p327_p0 = scmp.lt.s32.totalorder %s1382_s18, 1  ;;  %v1396_v0 = vmov 0   ;;  %vm352_vm0 = vcmask 130048   ;;  %v350_v1 = vld [vmem:[%s269_s8] sm:$0xff]  ;;  %v351_v2 = vld [vmem:[%s269_s8 + $0x8] sm:$0xff] }
  0x54   : > { %1243 = vset.pattern.permute.xlu0 %v1396_v0  ;;  %v360_v4 = vand.u32 4294901760, %v350_v1  ;;  %v363_v5 = vand.u32 4294901760, %v351_v2  ;;  %s325_s27 = scalar_lea.vmem [#allocation7], %s1596_s26  ;;  %v876_v40 = vld [vmem:[%s278_s25 + $0x8] sm:$0xff]  ;;  %s1070_s13 = sshll.u32 %s1382_s18, 8  ;;  %v875_v43 = vld [vmem:[%s278_s25] sm:$0xff] }
  0x55   : > { %s328_s9 = scalar_select %p327_p0, %s1382_s18, 1 }
  0x56   : > { %v1137_v11 = vpack.c.bf16 %v363_v5, %v360_v4  ;;  %v448_v13 = vsub.f32 %v350_v1, %v360_v4  ;;  %v455_v14 = vsub.f32 %v351_v2, %v363_v5  ;;  %s897_s12 = sshll.u32 %s325_s27, 4  ;;  %p1695_p12 = scmp.ne.s32.totalorder %s1688_s28, 0  ;;  %s1624_s12 = int_to_ptr.vmem [resolvable:$true] %s897_s12 }
  0x57   : > { %s1068_s11 = sshll.u32 %s328_s9, 4  ;;  %s1629_s9 = scalar_lea.hbm %s1682_s4, %s1070_s13 }
  0x58   : > { %s334_s6 = scalar_lea.vmem %s1678_s0, %s1068_s11  ;;  %s344_s21 = scalar_lea.vmem %s1680_s2, %s1068_s11  ;;  %1150 = vmatprep.subr.bf16.mxu0 %v1137_v11  ;;  %1138 = vmatprep.subr.bf16.mxu1 %v1137_v11  ;;  %v449_v18 = vand.u32 4294901760, %v448_v13  ;;  %v456_v19 = vand.u32 4294901760, %v455_v14  ;;  %v1145_v32 = vpack.c.bf16 %v455_v14, %v448_v13 }
  0x59   : > { %v348_v3 = vld [vmem:[%s334_s6] sm:$0xff]  ;;  %v349_v6 = vld [vmem:[%s334_s6 + $0x8] sm:$0xff]  ;;  %1152 = vmatpush3.bf16.msra.mxu0 %v1137_v11  ;;  %1140 = vmatpush3.bf16.msra.mxu1 %v1137_v11  ;;  %s882_s11 = scalar_lea.sflag [#allocation4], %s1593_s14  ;;  %s1304_s18 = scalar_lea.vmem %s1624_s12, 256 }
  0x5a   : > { %v354_v7 = vsel %vm352_vm0, %v348_v3, 0  ;;  %v861_v8 = vld [vmem:[%s344_s21] sm:$0xff]  ;;  %v357_v9 = vsel %vm352_vm0, %v349_v6, 0  ;;  %v862_v16 = vld [vmem:[%s344_s21 + $0x8] sm:$0xff]  ;;  %v450_v22 = vsub.f32 %v448_v13, %v449_v18  ;;  %v457_v23 = vsub.f32 %v455_v14, %v456_v19  ;;  %p1305_p3 = scmp.ne.s32.totalorder %s1624_s12, %s1304_s18  ;;  %s1397_s26 = smov [#allocation7]  }
  0x5b   : > { %v426_v10 = vand.u32 4294901760, %v354_v7  ;;  %865 = vperm.xlu0 %1243, %v861_v8   ;;  %v436_v12 = vand.u32 4294901760, %v357_v9  ;;  %v1153_v24 = vpack.c.bf16 %v456_v19, %v449_v18  ;;  %s1308_s25 = sshll.u32 %s1397_s26, 4  ;;  %s1309_s25 = int_to_ptr.vmem [resolvable:$false] %s1308_s25 }
  0x5c   : > { %v451_v27 = vand.u32 4294901760, %v450_v22  ;;  %v458_v28 = vand.u32 4294901760, %v457_v23  ;;  %p1306_p13 = pnand %p1305_p3, %p1695_p12  ;;  %s1310_s24 = scalar_lea.vmem %s1309_s25, 512 }
  0x5d   : > { %v427_v15 = vsub.f32 %v354_v7, %v426_v10  ;;  %v437_v17 = vsub.f32 %v357_v9, %v436_v12  ;;  %1154 = vmatprep.subr.bf16.mxu0 %v1153_v24  ;;  %p1311_p10 = scmp.lt.s32.totalorder %s1624_s12, %s1309_s25  ;;  %p1312_p9 = scmp.lt.s32.totalorder %s1310_s24, %s1304_s18 }
  0x5e   : > { %v1141_v31 = vpack.c.bf16 %v458_v28, %v451_v27  ;;  %p1307_p7 = pneg %p1306_p13 }
  0x5f   : > { %v428_v20 = vand.u32 4294901760, %v427_v15  ;;  %v438_v21 = vand.u32 4294901760, %v437_v17  ;;  %870 = vperm.xlu0 %1243, %v862_v16   ;;  %p1313_p11 = por %p1312_p9, %p1311_p10 }
  0x60   : > { %1142 = vmatprep.subr.bf16.mxu1 %v1141_v31 }
  0x61   : > { %1120 = vmatprep.mubr.f32.mxu0 %v428_v20  ;;  %v429_v25 = vsub.f32 %v427_v15, %v428_v20  ;;  %v439_v26 = vsub.f32 %v437_v17, %v438_v21  ;;  %p1314_p1 = pnand %p1313_p11, %p1307_p7 }
  0x62   : > { %1121 = vmatmul.mubr.f32.vlgmr.msra.gmra.mrb[0].mxu0 %v438_v21 }
  0x63   : > { %v430_v29 = vand.u32 4294901760, %v429_v25  ;;  %1156 = vmatpush3.bf16.msra.mxu0 %v1153_v24  ;;  %1127 = vmatprep.mubr.f32.mxu0 %v426_v10  ;;  %v440_v30 = vand.u32 4294901760, %v439_v26 }
  0x64   : > { %1158 = vmatprep.subr.bf16.mxu0 %v1137_v11 }
  0x65   : > { %1099 = vmatprep.mubr.f32.mxu1 %v430_v29 }
  0x66   : > { %1100 = vmatmul.mubr.f32.vlgmr.msra.gmra.mrb[0].mxu1 %v440_v30 }
  0x67   : > { %1144 = vmatpush3.bf16.msra.mxu1 %v1141_v31  ;;  %1106 = vmatprep.mubr.f32.mxu1 %v426_v10 }
  0x68   : > { %1146 = vmatprep.subr.bf16.mxu1 %v1145_v32 }
  0x6a   : > { %1128 = vmatmul.mubr.f32.vlgmr.msra.gmra.mrb[0].mxu0 %v436_v12 }
  0x6b   : > { %1160 = vmatpush3.bf16.msra.mxu0 %v1137_v11  ;;  %1134 = vmatprep.mubr.f32.mxu0 %v426_v10 }
  0x6e   : > { %1107 = vmatmul.mubr.f32.vlgmr.msra.gmra.mrb[0].mxu1 %v436_v12 }
  0x6f   : > { %1148 = vmatpush3.bf16.msra.mxu1 %v1145_v32  ;;  %1113 = vmatprep.mubr.f32.mxu1 %v427_v15 }
  0x72   : > { %1135 = vmatmul.mubr.f32.vlgmr.msra.gmra.mrb[0].mxu0 %v436_v12 }
  0x76   : > { %1114 = vmatmul.mubr.f32.vlgmr.msra.gmra.mrb[0].mxu1 %v437_v17 }
  0xda   : > { %v866_v33 = vpop.permute.xlu0 %865 }
  0xde   : > { %v871_v39 = vpop.permute.xlu0 %870 }
 0x145   : > { %v1136_v34 = vpop.f32.mrb[0].mxu0 }
 0x146   : > { %v851_v35 = vpop.f32.mrb[1].mxu0 }
 0x149   : > { %v1115_v36 = vpop.f32.mrb[0].mxu1 }
 0x14a   : > { %v1161_v37 = vadd.f32 %v1136_v34, %v1115_v36  ;;  %v605_v38 = vpop.f32.mrb[1].mxu1 }
 0x14b   : > { %v1162_v41 = vadd.f32 %v851_v35, %v605_v38 }
 0x14c   : > { %v874_v42 = vmul.f32 %v1161_v37, %v871_v39 }
 0x14d   : > { %v873_v44 = vmul.f32 %v1162_v41, %v866_v33 }
 0x14e   : > { %v878_v45 = vadd.f32 %v876_v40, %v874_v42 }
 0x14f   : > { %v877_v46 = vadd.f32 %v875_v43, %v873_v44 }
 0x150   : > { %880 = vst [vmem:[%s325_s27 + $0x8] sm:$0xff] %v878_v45 }
 0x151   : > { %879 = vst [vmem:[%s325_s27] sm:$0xff] %v877_v46 }
 0x152   : > { %1317 = shalt.err (!%p1314_p1)
}
 0x153   : > { %s1318_s10 = scalar_lea.hbm %s1629_s9, 256  ;;  %s1322_s7 = scalar_lea.hbm %s1682_s4, 512 }
 0x154   : > { %p1319_p6 = scmp.ne.s32.totalorder %s1629_s9, %s1318_s10  ;;  %p1323_p4 = scmp.lt.u32.totalorder %s1629_s9, %s1682_s4 }
 0x155   : > { %p1324_p8 = scmp.lt.u32.totalorder %s1322_s7, %s1318_s10  ;;  %p1326_p3 = scmp.lt.u32.totalorder %s1318_s10, %s1629_s9 }
 0x156   : > { %p1320_p2 = pnand %p1319_p6, %p1695_p12 }
 0x157   : > { %p1325_p0 = por %p1324_p8, %p1323_p4 }
 0x158   : > { %p1321_p5 = pneg %p1320_p2 }
 0x159   : > { %p1327_p13 = por %p1326_p3, %p1325_p0 }
 0x15b   : > { %p1328_p7 = pnand %p1327_p13, %p1321_p5 }
 0x15d   : > { %1331 = shalt.err (!%p1328_p7)
}
 0x15e   : > { %s1398_s13 = smov 128   ;;  %s1399_s8 = smov 8  }
 0x15f   : > { %1175 = dma.vmem_to_hbm [thread:$0]  (%p1695_p12), %s1624_s12, 256, %s1629_s9, %s882_s11, %s1398_s13, %s1398_s13, %s1399_s8  }
 0x160 PF: > { %s912_s5 = sand.u32 1, %s1370_s15   ;;  %p1696_p10 = scmp.ne.s32.totalorder %s1689_s30, 0 }
 0x161   : > { %p1697_p9 = scmp.ge.s32.totalorder %s1390_s20, 2  ;;  %s913_s18 = scalar_lea.sflag [#allocation4], %s912_s5 }
 0x163   : > { %p1185_p11 = pnand %p1697_p9, %p1696_p10 }
 0x165   : > { %1365 = dma.done.wait (!%p1185_p11), %s913_s18, 256  }
 0x166   : > { %1367 = vsyncadd (!%p1185_p11), %s913_s18, 4294967040  ;;  %s23_s20 = sadd.s32 1, %s1390_s20   ;;  %s1698_s15 = smov %s1374_s16 }
 0x167   : > { %p20_p1 = scmp.ge.s32.totalorder %s23_s20, 4   ;;  %s1699_s16 = smov %s1378_s17 }
 0x168   : > { %s1700_s17 = smov %s1481_s29  ;;  %s1701_s18 = smov %s1386_s19 }
 0x169   : > { %s1702_s19 = smov %s1704_s23  ;;  %22 = sbr.rel (!%p20_p1) target bundleno = 8 (0x8), region = 100 }
 0x170   :  { %918 = vsyncpa [#allocation3], 1 }
 0x171   :  { %920 = vsyncpa [#allocation3 + $0x1], 1 }
 0x172   :  { %921 = vsyncpa [#allocation6], 1 }
 0x173   :  { %923 = vsyncpa [#allocation6 + $0x1], 1 }
 0x174   :  { %924 = vsyncpa [#allocation4], 1 }
 0x175   :  { %926 = vsyncpa [#allocation4 + $0x1], 1 }

</bundles_post_ra>
